<compile_context>
chip_gen: v7x
topology: tpu7x:2x2x1
jax: 0.10.0
libtpu: 0.0.40
codegen_flags: <defaults>
</compile_context>

<pallas_src>
import jax
import jax.numpy as jnp
from jax.experimental import pallas as pl
from jax.experimental.pallas import tpu as pltpu


def _identity_kernel(x_ref, o_ref):
    # Pure copy: the "compute" of an identity layer.
    o_ref[...] = x_ref[...]


_LANE = 128
_MAX_LANE_WIDTH = 8192  # widest lane-dense last dim we try


def _choose_width(total: int) -> int:
    """Largest multiple of 128 (<= _MAX_LANE_WIDTH) dividing `total`.

    Prefers widths that leave at least 8 rows (full sublane tiles); falls back
    to the largest divisor for tiny inputs; returns 0 if total % 128 != 0.
    """
    best_any = 0
    c = _MAX_LANE_WIDTH
    while c >= _LANE:
        if total % c == 0:
            if best_any == 0:
                best_any = c
            if total // c >= 8:
                return c
        c -= _LANE
    return best_any


def _block_budget():
    """(target_block_bytes, vmem_limit_bytes) gated on this chip's VMEM size."""
    vmem_cap = 64 * 1024 * 1024  # conservative default (v7x)
    try:
        info = pltpu.get_tpu_info()
        cap = getattr(info, "vmem_capacity_bytes", None)
        if cap:
            vmem_cap = int(cap)
    except Exception:
        pass
    if vmem_cap >= 100 * 1024 * 1024:
        # v5e / v6e: 128 MiB VMEM -> 16 MiB blocks (in+out x 2 bufs = 64 MiB).
        return 16 * 1024 * 1024, 96 * 1024 * 1024
    # v7x: 64 MiB VMEM -> 8 MiB blocks (in+out x 2 bufs = 32 MiB).
    return 8 * 1024 * 1024, 48 * 1024 * 1024


def identity(x: jax.Array) -> jax.Array:
    """Identity forward pass implemented with a Pallas TPU kernel."""
    orig_shape = x.shape
    total = x.size
    if total == 0:
        return x

    itemsize = jnp.dtype(x.dtype).itemsize
    width = _choose_width(total)
    if width == 0:
        # Element count not a multiple of 128: Identity requires no data
        # movement, so returning x is exact and beats any copy kernel.
        # TODO(synk): if a materialized copy is ever required here, split into
        # a 128-aligned prefix (tiled path) plus a tiny tail kernel.
        return x

    rows = total // width
    x2d = x.reshape(rows, width)

    nbytes = total * itemsize
    cost = pl.CostEstimate(flops=0, transcendentals=0, bytes_accessed=2 * nbytes)

    target_block_bytes, vmem_limit_bytes = _block_budget()

    # Sublane packing for the second-to-last block dim:
    # f32 -> 8, bf16 -> 16, int8 -> 32 rows.
    packing = max(1, 4 // itemsize) * 8

    # Target ~8/16 MiB blocks; round down to the packing multiple.
    tile_rows = (target_block_bytes // (width * itemsize)) // packing * packing
    tile_rows = max(packing, tile_rows)

    if rows >= 2 * packing:
        # Guarantee >= 2 grid steps so "parallel" can shard the copy across
        # both TensorCores on v7x (one block would leave a core idle).
        half = max(packing, (rows // 2) // packing * packing)
        tile_rows = min(tile_rows, half)
    else:
        tile_rows = min(tile_rows, rows)  # == rows -> full-dim block (legal)

    grid = (pl.cdiv(rows, tile_rows),)  # Pallas masks the ragged last block.

    out2d = pl.pallas_call(
        _identity_kernel,
        out_shape=jax.ShapeDtypeStruct((rows, width), x2d.dtype),
        grid_spec=pltpu.PrefetchScalarGridSpec(
            num_scalar_prefetch=0,
            grid=grid,
            in_specs=[pl.BlockSpec((tile_rows, width), lambda i: (i, 0))],
            out_specs=pl.BlockSpec((tile_rows, width), lambda i: (i, 0)),
        ),
        cost_estimate=cost,
        compiler_params=pltpu.CompilerParams(
            dimension_semantics=("parallel",),
            vmem_limit_bytes=vmem_limit_bytes,
        ),
    )(x2d)
    return out2d.reshape(orig_shape)


if __name__ == "__main__":
    key = jax.random.PRNGKey(0)
    k0, k1, k2 = jax.random.split(key, 3)

    # Identity module has no parameters; just build deterministic inputs.
    # 1) Small NCHW input (the module's typical use in a ResNet block).
    x = jax.random.normal(k0, (2, 4, 16, 16), dtype=jnp.float32)
    y = jax.block_until_ready(identity(x))
    assert y.shape == x.shape and y.dtype == x.dtype
    assert bool(jnp.all(y == x))

    # 2) Multi-step grid with a ragged last block (rows % tile_rows != 0).
    x_big = jax.random.normal(k1, (20, 8192), dtype=jnp.float32)
    y_big = jax.block_until_ready(identity(x_big))
    assert y_big.shape == x_big.shape and y_big.dtype == x_big.dtype
    assert bool(jnp.all(y_big == x_big))

    # 3) Ragged element count (not a multiple of 128) -> no-op path.
    x_rag = jax.random.normal(k2, (3, 5, 7), dtype=jnp.float32)
    y_rag = jax.block_until_ready(identity(x_rag))
    assert y_rag.shape == x_rag.shape and y_rag.dtype == x_rag.dtype
    assert bool(jnp.all(y_rag == x_rag))

    print("KERNEL_OK")
</pallas_src>

<mosaic_0001>
module attributes {stable_mosaic.version = 11 : i64} {
  func.func @_identity_kernel(%arg0: i32, %arg1: memref<8x256xf32, #tpu.memory_space<vmem>>, %arg2: memref<8x256xf32, #tpu.memory_space<vmem>>) attributes {dimension_semantics = [#tpu.dimension_semantics<parallel>], iteration_bounds = array<i64: 1>, scalar_prefetch = 0 : i64, scratch_operands = 0 : i64, tpu.core_type = #tpu.core_type<tc>, window_params = [{transform_indices = @transform_0, window_bounds = array<i64: 8, 256>}, {transform_indices = @transform_1, window_bounds = array<i64: 8, 256>}]} {
    %c0 = arith.constant 0 : index
    %c0_0 = arith.constant 0 : index
    %0 = vector.load %arg1[%c0, %c0_0] : memref<8x256xf32, #tpu.memory_space<vmem>>, vector<8x256xf32>
    %c0_1 = arith.constant 0 : index
    %c0_2 = arith.constant 0 : index
    %1 = vector.load %arg2[%c0_1, %c0_2] : memref<8x256xf32, #tpu.memory_space<vmem>>, vector<8x256xf32>
    tpu.vector_store %arg2[%c0_1, %c0_2], %0 {strides = array<i32>} : memref<8x256xf32, #tpu.memory_space<vmem>>, vector<8x256xf32>,
    return
  }
  func.func @transform_0(%arg0: i32) -> (i32, i32) {
    %c0_i32 = arith.constant 0 : i32
    %c0_i32_0 = arith.constant 0 : i32
    return %arg0, %c0_i32 : i32, i32
  }
  func.func @transform_1(%arg0: i32) -> (i32, i32) {
    %c0_i32 = arith.constant 0 : i32
    %c0_i32_0 = arith.constant 0 : i32
    return %arg0, %c0_i32 : i32, i32
  }
}

</mosaic_0001>

<bundles_post_ra>
// kernel: tpu_custom_call.1
= control target key start
LH: loop header
LB: loop body
LE: loop exit
PB: predicated region body
PF: predicated region fallthrough
CT: control target
= control target key end

     0   :  { %6 = vsyncpa [#allocation3], 0  ;;  %s126_s0 = inlined_call_operand.hbm [shape: f32[8,256], index: 0, kind: input, shape index: {}]   ;;  %s127_s1 = inlined_call_operand.hbm [shape: f32[8,256], index: 1, kind: output, shape index: {}]  }
   0x1   :  { %7 = vsyncpa [#allocation4], 0  ;;  %s90_s6 = smov [#allocation2]   ;;  %s42_s10 = scalar_lea.hbm %s126_s0, 256 }
   0x2   :  { %s14_s7 = sshll.u32 %s90_s6, 4  ;;  %p43_p0 = scmp.ne.s32.totalorder %s126_s0, %s42_s10  ;;  %s15_s7 = int_to_ptr.vmem [resolvable:$true] %s14_s7 }
   0x3   :  { %p46_p1 = scmp.lt.u32.totalorder %s42_s10, %s126_s0 }
   0x5   :  { %p48_p2 = pnand %p46_p1, %p43_p0 }
   0x7   :  { %51 = shalt.err (!%p48_p2)
}
   0x8   :  { %s52_s15 = scalar_lea.vmem %s15_s7, 256  ;;  %p57_p4 = scmp.lt.s32.totalorder %s15_s7, %s15_s7 }
   0x9   :  { %p53_p3 = scmp.ne.s32.totalorder %s15_s7, %s52_s15  ;;  %p58_p5 = scmp.lt.s32.totalorder %s52_s15, %s52_s15 }
   0xb   :  { %p59_p6 = por %p58_p5, %p57_p4 }
   0xd   :  { %p60_p7 = pnand %p59_p6, %p53_p3 }
   0xf   :  { %63 = shalt.err (!%p60_p7)
}
  0x10   :  { %17 = dma.hbm_to_vmem [thread:$0]  %s126_s0, 256, %s15_s7, [#allocation3]  }
  0x11   :  { %86 = dma.done.wait [#allocation3], 256  }
  0x12   :  { %87 = vsyncadd [#allocation3], 4294967040  ;;  %s91_s18 = smov [#allocation5]   ;;  %v21_v0 = vld [vmem:[#allocation2] sm:$0xff]  ;;  %v22_v1 = vld [vmem:[#allocation2 + $0x8] sm:$0xff] }
  0x13   :  { %s31_s19 = sshll.u32 %s91_s18, 4  ;;  %23 = vst [vmem:[#allocation5] sm:$0xff] %v21_v0  ;;  %24 = vst [vmem:[#allocation5 + $0x8] sm:$0xff] %v22_v1  ;;  %s32_s19 = int_to_ptr.vmem [resolvable:$true] %s31_s19 }
  0x14   :  { %s64_s20 = scalar_lea.vmem %s32_s19, 256  ;;  %p69_p9 = scmp.lt.s32.totalorder %s32_s19, %s32_s19 }
  0x15   :  { %p65_p8 = scmp.ne.s32.totalorder %s32_s19, %s64_s20  ;;  %p70_p10 = scmp.lt.s32.totalorder %s64_s20, %s64_s20 }
  0x17   :  { %p71_p11 = por %p70_p10, %p69_p9 }
  0x19   :  { %p72_p12 = pnand %p71_p11, %p65_p8 }
  0x1b   :  { %75 = shalt.err (!%p72_p12)
}
  0x1c   :  { %s76_s0 = scalar_lea.hbm %s127_s1, 256 }
  0x1d   :  { %p77_p13 = scmp.ne.s32.totalorder %s127_s1, %s76_s0  ;;  %p80_p0 = scmp.lt.u32.totalorder %s76_s0, %s127_s1 }
  0x1f   :  { %p82_p1 = pnand %p80_p0, %p77_p13 }
  0x21   :  { %85 = shalt.err (!%p82_p1)
}
  0x22   :  { %34 = dma.vmem_to_hbm [thread:$0]  %s32_s19, 256, %s127_s1, [#allocation4]  }
  0x23   :  { %88 = dma.done.wait [#allocation4], 256  }
  0x24   :  { %89 = vsyncadd [#allocation4], 4294967040 }
  0x25   :  { %38 = vsyncpa [#allocation3], 1 }
  0x26   :  { %39 = vsyncpa [#allocation4], 1 }

</bundles_post_ra>
